<compile_context>
chip_gen: v5e
topology: v5e:2x2
jax: 0.10.0
libtpu: 0.0.40
codegen_flags: <defaults>
</compile_context>

<pallas_src>
import jax
import jax.numpy as jnp
from jax.experimental import pallas as pl
from jax.experimental.pallas import tpu as pltpu

_LANE = 128


def _bias_broadcast_kernel(b_ref, o_ref):
    """Write one (tm, W) lane-dense slab of the output: every row is the bias row."""
    o_ref[...] = jnp.broadcast_to(b_ref[...], o_ref.shape).astype(o_ref.dtype)


def multi_head_attention(x, wt, wp, bp, block_size):
    """x: (B, T, C); wt: (C*C, C) head transformation weight (dead in the forward);
    wp: (C, C) proj weight (multiplied by the all-zero head output -> dead);
    bp: (C,) proj bias.  Dropout is eval-mode identity."""
    B, T, C = x.shape
    assert T <= block_size
    assert wt.shape == (C * C, C) and wp.shape == (C, C) and bp.shape == (C,)
    M = B * T

    # Fold rows so the output last dim is a multiple of 128 lanes (unmasked vst).
    if C % _LANE == 0:
        fold = 1
    elif _LANE % C == 0 and M % (_LANE // C) == 0:
        fold = _LANE // C
    else:
        fold = 1                       # awkward C: fall back to masked stores
    W = C * fold
    M2 = M // fold

    # One lane-dense bias row: `fold` row-major copies of bp (tiny, <= 512 B for f32).
    row = jnp.tile(bp, fold).reshape(1, W).astype(x.dtype)

    tm = M2 if M2 <= 512 else 512      # 512-row tiles (multiple of 8); ragged tail OK
    grid = (pl.cdiv(M2, tm),)

    itemsize = jnp.dtype(x.dtype).itemsize
    cost = pl.CostEstimate(flops=0, transcendentals=0,
                           bytes_accessed=(M2 * W + W) * itemsize)

    y2 = pl.pallas_call(
        _bias_broadcast_kernel,
        out_shape=jax.ShapeDtypeStruct((M2, W), x.dtype),
        grid=grid,
        in_specs=[pl.BlockSpec((1, W), lambda i: (0, 0))],     # grid-invariant bias row
        out_specs=pl.BlockSpec((tm, W), lambda i: (i, 0)),
        compiler_params=pltpu.CompilerParams(dimension_semantics=("parallel",)),
        cost_estimate=cost,
    )(row)
    return y2.reshape(B, T, C)


def reference(x, wt, wp, bp, block_size):
    """Pure-JAX transliteration of the PyTorch forward (eval mode, num_heads=1)."""
    B, T, C = x.shape
    transform = jnp.einsum('btc,kc->btk', x, wt)              # Linear(C, C^2), no bias
    transform = transform.reshape(B, T, C, C) * 0
    out = jnp.einsum('bcij,btj->btcj', transform, x)          # (B, T, T, C)
    tril = jnp.tril(jnp.ones((block_size, block_size), x.dtype))
    mask = (tril[:T, :T] == 0)[None, :, :, None]
    out = jnp.where(mask, 0.0, out).sum(axis=2)               # (B, T, C)
    return jnp.einsum('btc,dc->btd', out, wp) + bp            # proj (Linear with bias)


if __name__ == "__main__":
    key = jax.random.PRNGKey(0)
    B, T = 2, 8
    n_embd = 32          # C
    block_size = 8
    num_heads = 1        # forward is only shape-consistent for 1 head
    head_size = 16       # present in __init__ but unused by the forward pass
    dropout = 0.0        # TODO(synk): dropout is eval-mode identity (torch RNG not reproduced)

    kx, kwt, kwp, kbp = jax.random.split(key, 4)
    x = jax.random.normal(kx, (B, T, n_embd), jnp.float32)
    wt = jax.random.normal(kwt, (n_embd * n_embd, n_embd), jnp.float32) * 0.02
    wp = jax.random.normal(kwp, (n_embd, n_embd), jnp.float32) * 0.02
    bp = jax.random.normal(kbp, (n_embd,), jnp.float32) * 0.02

    y = multi_head_attention(x, wt, wp, bp, block_size)
    y = jax.block_until_ready(y)

    y_ref = reference(x, wt, wp, bp, block_size)
    assert y.shape == (B, T, n_embd)
    assert jnp.allclose(y, y_ref, atol=1e-5, rtol=1e-5), "Pallas kernel mismatch vs JAX reference"
    print("KERNEL_OK")
</pallas_src>

<mosaic_0001>
module attributes {stable_mosaic.version = 11 : i64} {
  func.func @_bias_broadcast_kernel(%arg0: i32, %arg1: memref<1x128xf32, #tpu.memory_space<vmem>>, %arg2: memref<4x128xf32, #tpu.memory_space<vmem>>) attributes {dimension_semantics = [#tpu.dimension_semantics<parallel>], iteration_bounds = array<i64: 1>, scalar_prefetch = 0 : i64, scratch_operands = 0 : i64, tpu.core_type = #tpu.core_type<tc>, window_params = [{pipeline_mode = #tpu.pipeline_mode<synchronous>, transform_indices = @transform_0, window_bounds = array<i64: 1, 128>}, {transform_indices = @transform_1, window_bounds = array<i64: 4, 128>}]} {
    %c0 = arith.constant 0 : index
    %c0_0 = arith.constant 0 : index
    %0 = vector.load %arg1[%c0, %c0_0] : memref<1x128xf32, #tpu.memory_space<vmem>>, vector<1x128xf32>
    %1 = vector.shape_cast %0 : vector<1x128xf32> to vector<1x128xf32>
    %2 = vector.broadcast %1 : vector<1x128xf32> to vector<4x128xf32>
    %c0_1 = arith.constant 0 : index
    %c0_2 = arith.constant 0 : index
    %3 = vector.load %arg2[%c0_1, %c0_2] : memref<4x128xf32, #tpu.memory_space<vmem>>, vector<4x128xf32>
    tpu.vector_store %arg2[%c0_1, %c0_2], %2 {strides = array<i32>} : memref<4x128xf32, #tpu.memory_space<vmem>>, vector<4x128xf32>,
    return
  }
  func.func @transform_0(%arg0: i32) -> (i32, i32) {
    %c0_i32 = arith.constant 0 : i32
    %c0_i32_0 = arith.constant 0 : i32
    %c0_i32_1 = arith.constant 0 : i32
    return %c0_i32, %c0_i32_0 : i32, i32
  }
  func.func @transform_1(%arg0: i32) -> (i32, i32) {
    %c0_i32 = arith.constant 0 : i32
    %c0_i32_0 = arith.constant 0 : i32
    return %arg0, %c0_i32 : i32, i32
  }
}

</mosaic_0001>

<bundles_post_ra>
// kernel: tpu_custom_call.1
= control target key start
LH: loop header
LB: loop body
LE: loop exit
PB: predicated region body
PF: predicated region fallthrough
CT: control target
= control target key end

     0   :  { %6 = vsyncpa [#allocation3], 0  ;;  %s118_s0 = inlined_call_operand.hbm [shape: f32[1,128], index: 0, kind: input, shape index: {}]   ;;  %s119_s1 = inlined_call_operand.hbm [shape: f32[4,128], index: 1, kind: output, shape index: {}]  }
   0x1   :  { %7 = vsyncpa [#allocation4], 0  ;;  %s13_s8 = sshll.u32 %s118_s0, 4  ;;  %s100_s9 = smov [#allocation2]   ;;  %s14_s8 = int_to_ptr.hbm [resolvable:$true] %s13_s8 }
   0x2   :  { %s15_s10 = sshll.u32 %s100_s9, 4  ;;  %s16_s10 = int_to_ptr.vmem [resolvable:$true] %s15_s10 }
   0x3   :  { %18 = dma.hbm_to_vmem [thread:$0]  %s14_s8, 16, %s16_s10, [#allocation3]  }
   0x4   :  { %96 = dma.done.wait [#allocation3], 16  }
   0x5   :  { %97 = vsyncadd [#allocation3], 4294967280  ;;  %s101_s11 = smov [#allocation5]   ;;  %s35_s15 = sshll.u32 %s119_s1, 4  ;;  %v47_v0 = vld [vmem:[#allocation2] ss:$0 sm:$0xff]  ;;  %s36_s15 = int_to_ptr.hbm [resolvable:$true] %s35_s15 }
   0x6   :  { %s33_s12 = sshll.u32 %s101_s11, 4  ;;  %27 = vst [vmem:[#allocation5] sm:$0xf] %v47_v0  ;;  %s34_s12 = int_to_ptr.vmem [resolvable:$true] %s33_s12 }
   0x7   :  { %38 = dma.vmem_to_hbm [thread:$0]  %s34_s12, 64, %s36_s15, [#allocation4]  }
   0x8   :  { %98 = dma.done.wait [#allocation4], 64  }
   0x9   :  { %99 = vsyncadd [#allocation4], 4294967232 }
   0xa   :  { %43 = vsyncpa [#allocation3], 1 }
   0xb   :  { %44 = vsyncpa [#allocation4], 1 }

</bundles_post_ra>
